<compile_context>
chip_gen: v5e
topology: v5e:2x2
jax: 0.10.0
libtpu: 0.0.40
codegen_flags: <defaults>
</compile_context>

<pallas_src>
from functools import partial

import jax
import jax.numpy as jnp
from jax import lax
from jax.experimental import pallas as pl
from jax.experimental.pallas import tpu as pltpu


def scoring_kernel(y_ref, p_ref, stat_ref, seg_ref, wb_ref, out_ref, *, inv_scale):
    """One (batch, T-tile) grid step.

    y_ref:    (1, tT, D)   prediction tile
    p_ref:    (1, 1, L)    weather, lane-dense: lane k*Tw + w holds weather[b, w, k]
    stat_ref: (1, 2, L)    row 0 / row 1 = per-feature max / min of p (repeated Tw times)
    seg_ref:  (L, L)       block-diagonal ones: seg[i, j] = (i // Tw == j // Tw)
    wb_ref:   (D, 2)       column 0 = Linear weight, column 1 = Linear bias
    out_ref:  (1, tT, L)   softmax scores, lane-dense slab
    """
    y = y_ref[0]                                         # (tT, D)
    wb = wb_ref[...] * inv_scale                         # fold 1/sqrt(D) into the params

    # k-independent D-reductions on the (otherwise idle) MXU:
    #   proj[:, 0] = (y·weight)/sqrt(D),  proj[:, 1] = (y·bias)/sqrt(D)
    proj = jnp.dot(y, wb, preferred_element_type=jnp.float32,
                   precision=lax.Precision.HIGHEST)      # (tT, 2)
    yw = proj[:, 0:1]                                    # (tT, 1)
    yb = proj[:, 1:2]                                    # (tT, 1)

    p = p_ref[0]                                         # (1, L)
    pmax = stat_ref[0, 0:1, :]                           # (1, L)
    pmin = stat_ref[0, 1:2, :]                           # (1, L)

    # Rank-1 scores for every feature at once (every lane does useful work).
    s = yw * p + yb                                      # (tT, L)
    # Exact per-feature row max, analytically from the rank-1 structure.
    m = yb + jnp.where(yw >= 0.0, yw * pmax, yw * pmin)  # (tT, L)
    e = jnp.exp(s - m)                                   # EUP, lane-dense, values in (0, 1]

    # Per-feature denominator via the idle MXU: multiplying by the block-diagonal
    # ones matrix both sums each Tw segment and broadcasts the sum back across
    # that segment's lanes.  Every entry is >= 1 (argmax lane contributes exp(0)).
    denom = jnp.dot(e, seg_ref[...], preferred_element_type=jnp.float32,
                    precision=lax.Precision.HIGHEST)     # (tT, L)

    out_ref[0] = (e * pl.reciprocal(denom, approx=True)).astype(out_ref.dtype)


def _pick_row_tile(T, max_rows):
    """Largest T-tile that respects the 8-sublane rule and the VMEM row budget."""
    if T <= max_rows:
        return T                                # whole axis in one block (always legal)
    limit = max(8, (max_rows // 8) * 8)
    for cand in range(limit, 7, -8):            # multiples of 8, descending
        if T % cand == 0:
            return cand
    return T                                    # no aligned divisor; fall back to full T


def scoring_mechanism(y_hat, weather_seq, weight, bias):
    """Pallas equivalent of ScoringMechanism.forward.

    y_hat:       (B, T, D)  float32
    weather_seq: (B, Tw, K) float32
    weight:      (D, 1)     float32  -- nn.Linear(1, D).weight
    bias:        (D,)       float32  -- nn.Linear(1, D).bias
    Returns a stacked (K, B, T, Tw) float32 array; element k equals the k-th
    entry of the PyTorch module's returned list.
    """
    B, T, D = y_hat.shape
    _, Tw, K = weather_seq.shape
    L = K * Tw
    inv_scale = 1.0 / float(D) ** 0.5

    y_hat = y_hat.astype(jnp.float32)
    # Lane-dense weather: lane k*Tw + w <- weather[b, w, k].
    p_bkw = jnp.transpose(weather_seq.astype(jnp.float32), (0, 2, 1))      # (B, K, Tw)
    p_flat = p_bkw.reshape(B, 1, L)
    # Tiny per-feature max/min (O(B*K*Tw) work) so the kernel needs no XLU reduce.
    pmax = jnp.max(p_bkw, axis=-1, keepdims=True)                          # (B, K, 1)
    pmin = jnp.min(p_bkw, axis=-1, keepdims=True)
    stat = jnp.concatenate(
        [jnp.broadcast_to(pmax, (B, K, Tw)).reshape(B, 1, L),
         jnp.broadcast_to(pmin, (B, K, Tw)).reshape(B, 1, L)], axis=1)     # (B, 2, L)
    # Block-diagonal ones matrix: segment-sum + broadcast-back in one MXU matmul.
    seg = jnp.kron(jnp.eye(K, dtype=jnp.float32),
                   jnp.ones((Tw, Tw), dtype=jnp.float32))                  # (L, L)
    wb = jnp.stack([weight.reshape(D).astype(jnp.float32),
                    bias.reshape(D).astype(jnp.float32)], axis=1)          # (D, 2)

    # --- T-tile from a VMEM working-set budget (conservative across v5e/v6e/v7x) ---
    VMEM_BUDGET = 24 * 1024 * 1024
    bytes_per_row = 4 * (2 * D + 7 * L)         # 2-buf y row + 2-buf out row + ~5 slab temps
    fixed_bytes = 4 * (2 * L * L + 2 * 3 * L + 2 * 2 * D)
    max_rows = max(8, (VMEM_BUDGET - fixed_bytes) // bytes_per_row)
    tT = _pick_row_tile(T, max_rows)
    grid = (B, T // tT)

    out = pl.pallas_call(
        partial(scoring_kernel, inv_scale=inv_scale),
        out_shape=jax.ShapeDtypeStruct((B, T, L), jnp.float32),
        grid=grid,
        in_specs=[
            pl.BlockSpec((1, tT, D), lambda b, i: (b, i, 0)),
            pl.BlockSpec((1, 1, L), lambda b, i: (b, 0, 0)),
            pl.BlockSpec((1, 2, L), lambda b, i: (b, 0, 0)),
            pl.BlockSpec((L, L), lambda b, i: (0, 0)),
            pl.BlockSpec((D, 2), lambda b, i: (0, 0)),
        ],
        out_specs=pl.BlockSpec((1, tT, L), lambda b, i: (b, i, 0)),
        compiler_params=pltpu.CompilerParams(
            dimension_semantics=("parallel", "parallel"),
            vmem_limit_bytes=48 * 1024 * 1024),   # < v7x's 64 MiB physical VMEM
    )(y_hat, p_flat, stat, seg, wb)

    # (B, T, K*Tw) lane-dense slab -> (K, B, T, Tw) stacking of the PyTorch list.
    return jnp.transpose(out.reshape(B, T, K, Tw), (2, 0, 1, 3))


def _reference(y_hat, weather_seq, weight, bias):
    """Plain-JAX reference mirroring the PyTorch forward (stacked over k)."""
    D = y_hat.shape[-1]
    scale = float(D) ** 0.5
    outs = []
    for i in range(weather_seq.shape[-1]):
        p = weather_seq[:, :, i:i + 1]                        # (B, Tw, 1)
        p_proj = p @ weight.T + bias                          # (B, Tw, D)
        s = jnp.einsum("btd,bwd->btw", y_hat, p_proj) / scale
        outs.append(jax.nn.softmax(s, axis=-1))
    return jnp.stack(outs, axis=0)                            # (K, B, T, Tw)


if __name__ == "__main__":
    B, T, D, Tw, K = 2, 8, 32, 8, 3     # d_model = 32

    key = jax.random.PRNGKey(0)
    k1, k2, k3, k4 = jax.random.split(key, 4)
    y_hat = jax.random.normal(k1, (B, T, D), dtype=jnp.float32)
    weather_seq = jax.random.normal(k2, (B, Tw, K), dtype=jnp.float32)
    # Deterministic parameter init for nn.Linear(1, d_model)
    weight = jax.random.normal(k3, (D, 1), dtype=jnp.float32) * 0.5
    bias = jax.random.normal(k4, (D,), dtype=jnp.float32) * 0.1

    scores = scoring_mechanism(y_hat, weather_seq, weight, bias)
    scores = jax.block_until_ready(scores)

    ref = _reference(y_hat, weather_seq, weight, bias)
    assert scores.shape == (K, B, T, Tw)
    # Tolerance loosened slightly because of pl.reciprocal(approx=True).
    assert jnp.allclose(scores, ref, atol=1e-3, rtol=1e-3), "mismatch vs reference"

    print("KERNEL_OK")
</pallas_src>

<mosaic_0001>
module attributes {stable_mosaic.version = 11 : i64} {
  func.func @scoring_kernel(%arg0: i32, %arg1: i32, %arg2: memref<1x8x32xf32, #tpu.memory_space<vmem>>, %arg3: memref<1x1x24xf32, #tpu.memory_space<vmem>>, %arg4: memref<1x2x24xf32, #tpu.memory_space<vmem>>, %arg5: memref<24x24xf32, #tpu.memory_space<vmem>>, %arg6: memref<32x2xf32, #tpu.memory_space<vmem>>, %arg7: memref<1x8x24xf32, #tpu.memory_space<vmem>>) attributes {dimension_semantics = [#tpu.dimension_semantics<parallel>, #tpu.dimension_semantics<parallel>], iteration_bounds = array<i64: 2, 1>, scalar_prefetch = 0 : i64, scratch_operands = 0 : i64, tpu.core_type = #tpu.core_type<tc>, window_params = [{transform_indices = @transform_0, window_bounds = array<i64: 1, 8, 32>}, {transform_indices = @transform_1, window_bounds = array<i64: 1, 1, 24>}, {transform_indices = @transform_2, window_bounds = array<i64: 1, 2, 24>}, {pipeline_mode = #tpu.pipeline_mode<synchronous>, transform_indices = @transform_3, window_bounds = array<i64: 24, 24>}, {pipeline_mode = #tpu.pipeline_mode<synchronous>, transform_indices = @transform_4, window_bounds = array<i64: 32, 2>}, {transform_indices = @transform_5, window_bounds = array<i64: 1, 8, 24>}]} {
    %c0 = arith.constant 0 : index
    %c0_0 = arith.constant 0 : index
    %c0_1 = arith.constant 0 : index
    %0 = vector.load %arg2[%c0, %c0_0, %c0_1] : memref<1x8x32xf32, #tpu.memory_space<vmem>>, vector<1x8x32xf32>
    %1 = vector.shape_cast %0 : vector<1x8x32xf32> to vector<8x32xf32>
    %c0_2 = arith.constant 0 : index
    %c0_3 = arith.constant 0 : index
    %2 = vector.load %arg6[%c0_2, %c0_3] : memref<32x2xf32, #tpu.memory_space<vmem>>, vector<32x2xf32>
    %cst = arith.constant 0.176776692 : f32
    %3 = vector.broadcast %cst : f32 to vector<32x2xf32>
    %4 = arith.mulf %2, %3 : vector<32x2xf32>
    %cst_4 = arith.constant dense<0.000000e+00> : vector<8x2xf32>
    %5 = tpu.matmul %1, %4, %cst_4 {dimension_numbers = #tpu.dot_dimension_numbers<[1], [0], [0], [1], [0, 0, 1, 1], [], []>, precision = #tpu.contract_precision<fp32>} : vector<8x32xf32>, vector<32x2xf32>, vector<8x2xf32> -> vector<8x2xf32>
    %6 = vector.extract_strided_slice %5 {offsets = [0, 0], sizes = [8, 1], strides = [1, 1]} : vector<8x2xf32> to vector<8x1xf32>
    %7 = vector.extract_strided_slice %5 {offsets = [0, 1], sizes = [8, 1], strides = [1, 1]} : vector<8x2xf32> to vector<8x1xf32>
    %c0_5 = arith.constant 0 : index
    %c0_6 = arith.constant 0 : index
    %c0_7 = arith.constant 0 : index
    %8 = vector.load %arg3[%c0_5, %c0_6, %c0_7] : memref<1x1x24xf32, #tpu.memory_space<vmem>>, vector<1x1x24xf32>
    %9 = vector.shape_cast %8 : vector<1x1x24xf32> to vector<1x24xf32>
    %c0_8 = arith.constant 0 : index
    %c0_9 = arith.constant 0 : index
    %c0_10 = arith.constant 0 : index
    %10 = vector.load %arg4[%c0_8, %c0_9, %c0_10] : memref<1x2x24xf32, #tpu.memory_space<vmem>>, vector<1x1x24xf32>
    %11 = vector.shape_cast %10 : vector<1x1x24xf32> to vector<1x24xf32>
    %c0_11 = arith.constant 0 : index
    %c1 = arith.constant 1 : index
    %c0_12 = arith.constant 0 : index
    %12 = vector.load %arg4[%c0_11, %c1, %c0_12] : memref<1x2x24xf32, #tpu.memory_space<vmem>>, vector<1x1x24xf32>
    %13 = vector.shape_cast %12 : vector<1x1x24xf32> to vector<1x24xf32>
    %14 = vector.broadcast %6 : vector<8x1xf32> to vector<8x24xf32>
    %15 = vector.broadcast %9 : vector<1x24xf32> to vector<8x24xf32>
    %16 = arith.mulf %14, %15 : vector<8x24xf32>
    %17 = vector.broadcast %7 : vector<8x1xf32> to vector<8x24xf32>
    %18 = arith.addf %16, %17 : vector<8x24xf32>
    %cst_13 = arith.constant 0.000000e+00 : f32
    %19 = vector.broadcast %cst_13 : f32 to vector<8x1xf32>
    %20 = arith.cmpf oge, %6, %19 : vector<8x1xf32>
    %21 = vector.broadcast %6 : vector<8x1xf32> to vector<8x24xf32>
    %22 = vector.broadcast %11 : vector<1x24xf32> to vector<8x24xf32>
    %23 = arith.mulf %21, %22 : vector<8x24xf32>
    %24 = vector.broadcast %6 : vector<8x1xf32> to vector<8x24xf32>
    %25 = vector.broadcast %13 : vector<1x24xf32> to vector<8x24xf32>
    %26 = arith.mulf %24, %25 : vector<8x24xf32>
    %27 = vector.shape_cast %20 : vector<8x1xi1> to vector<8x1xi1>
    %28 = vector.broadcast %27 : vector<8x1xi1> to vector<8x24xi1>
    %29 = arith.select %28, %23, %26 : vector<8x24xi1>, vector<8x24xf32>
    %30 = vector.broadcast %7 : vector<8x1xf32> to vector<8x24xf32>
    %31 = arith.addf %30, %29 : vector<8x24xf32>
    %32 = arith.subf %18, %31 : vector<8x24xf32>
    %33 = math.exp %32 : vector<8x24xf32>
    %c0_14 = arith.constant 0 : index
    %c0_15 = arith.constant 0 : index
    %34 = vector.load %arg5[%c0_14, %c0_15] : memref<24x24xf32, #tpu.memory_space<vmem>>, vector<24x24xf32>
    %cst_16 = arith.constant dense<0.000000e+00> : vector<8x24xf32>
    %35 = tpu.matmul %33, %34, %cst_16 {dimension_numbers = #tpu.dot_dimension_numbers<[1], [0], [0], [1], [0, 0, 1, 1], [], []>, precision = #tpu.contract_precision<fp32>} : vector<8x24xf32>, vector<24x24xf32>, vector<8x24xf32> -> vector<8x24xf32>
    %36 = tpu.reciprocal %35 {approx = true} : vector<8x24xf32> -> vector<8x24xf32>
    %37 = arith.mulf %33, %36 : vector<8x24xf32>
    %c0_17 = arith.constant 0 : index
    %c0_18 = arith.constant 0 : index
    %c0_19 = arith.constant 0 : index
    %38 = vector.load %arg7[%c0_17, %c0_18, %c0_19] : memref<1x8x24xf32, #tpu.memory_space<vmem>>, vector<1x8x24xf32>
    %39 = vector.shape_cast %38 : vector<1x8x24xf32> to vector<8x24xf32>
    %40 = vector.shape_cast %37 : vector<8x24xf32> to vector<1x8x24xf32>
    tpu.vector_store %arg7[%c0_17, %c0_18, %c0_19], %40 {strides = array<i32>} : memref<1x8x24xf32, #tpu.memory_space<vmem>>, vector<1x8x24xf32>,
    return
  }
  func.func @transform_0(%arg0: i32, %arg1: i32) -> (i32, i32, i32) {
    %c0_i32 = arith.constant 0 : i32
    %c0_i32_0 = arith.constant 0 : i32
    return %arg0, %arg1, %c0_i32 : i32, i32, i32
  }
  func.func @transform_1(%arg0: i32, %arg1: i32) -> (i32, i32, i32) {
    %c0_i32 = arith.constant 0 : i32
    %c0_i32_0 = arith.constant 0 : i32
    %c0_i32_1 = arith.constant 0 : i32
    return %arg0, %c0_i32, %c0_i32_0 : i32, i32, i32
  }
  func.func @transform_2(%arg0: i32, %arg1: i32) -> (i32, i32, i32) {
    %c0_i32 = arith.constant 0 : i32
    %c0_i32_0 = arith.constant 0 : i32
    %c0_i32_1 = arith.constant 0 : i32
    return %arg0, %c0_i32, %c0_i32_0 : i32, i32, i32
  }
  func.func @transform_3(%arg0: i32, %arg1: i32) -> (i32, i32) {
    %c0_i32 = arith.constant 0 : i32
    %c0_i32_0 = arith.constant 0 : i32
    %c0_i32_1 = arith.constant 0 : i32
    return %c0_i32, %c0_i32_0 : i32, i32
  }
  func.func @transform_4(%arg0: i32, %arg1: i32) -> (i32, i32) {
    %c0_i32 = arith.constant 0 : i32
    %c0_i32_0 = arith.constant 0 : i32
    %c0_i32_1 = arith.constant 0 : i32
    return %c0_i32, %c0_i32_0 : i32, i32
  }
  func.func @transform_5(%arg0: i32, %arg1: i32) -> (i32, i32, i32) {
    %c0_i32 = arith.constant 0 : i32
    %c0_i32_0 = arith.constant 0 : i32
    return %arg0, %arg1, %c0_i32 : i32, i32, i32
  }
}

</mosaic_0001>

<bundles_post_ra>
// kernel: tpu_custom_call.1
= control target key start
LH: loop header
LB: loop body
LE: loop exit
PB: predicated region body
PF: predicated region fallthrough
CT: control target
= control target key end

     0   :  { %10 = vsyncpa [#allocation3], 0  ;;  %s1221_s0 = inlined_call_operand.hbm [shape: f32[2,8,32], index: 0, kind: input, shape index: {}]   ;;  %s1222_s1 = inlined_call_operand.vmem [shape: f32[2,1,24], index: 1, kind: input, shape index: {}]   ;;  %s1223_s2 = inlined_call_operand.vmem [shape: f32[2,2,24], index: 2, kind: input, shape index: {}]   ;;  %s1224_s3 = inlined_call_operand.vmem [shape: f32[24,24], index: 3, kind: input, shape index: {}]   ;;  %s1225_s4 = inlined_call_operand.vmem [shape: f32[32,2], index: 4, kind: input, shape index: {}]   ;;  %s1226_s5 = inlined_call_operand.hbm [shape: f32[2,8,24], index: 5, kind: output, shape index: {}]  }
   0x1   :  { %12 = vsyncpa [#allocation3 + $0x1], 0 }
   0x2   :  { %13 = vsyncpa [#allocation4], 0 }
   0x3   :  { %15 = vsyncpa [#allocation4 + $0x1], 0  ;;  %s1053_s18 = smov 0   ;;  %s1055_s19 = smov 0  }
   0x4   :  { %s1057_s20 = smov 0   ;;  %s1059_s21 = smov 0  }
   0x5   :  { %s1061_s22 = smov 0   ;;  %s1063_s23 = smov 0  }
   0x6 LB: > { %s820_s24 = sadd.s32 4294967295, %s1019_s23   ;;  %s821_s25 = sadd.s32 4294967294, %s1019_s23   ;;  %s1019_s23 = sphi %s1063_s23, %s21_s23   ;;  %s1015_s22 = sphi %s1061_s22, %s1235_s22   ;;  %s1011_s21 = sphi %s1059_s21, %s1234_s21   ;;  %s1007_s20 = sphi %s1057_s20, %s1233_s20   ;;  %s1003_s19 = sphi %s1055_s19, %s1232_s19   ;;  %s999_s18 = sphi %s1053_s18, %s1231_s18  }
   0x7   : > { %s33_s26 = sadd.s32 1, %s1015_s22  ;;  %s42_s27 = sadd.s32 1, %s1007_s20 }
   0x8   : > { %p35_p0 = scmp.ge.s32.totalorder %s33_s26, 2  ;;  %p49_p1 = scmp.ne.s32.totalorder %s1007_s20, %s1003_s19 }
   0x9   : > { %p50_p2 = scmp.eq.s32.totalorder %s1019_s23, 0  ;;  %p55_p3 = scmp.ne.s32.totalorder %s1003_s19, %s999_s18 }
   0xa   : > { %s1237_s26 = smov (%p35_p0, %s33_s26), 0  ;;  %p56_p5 = scmp.eq.s32.totalorder %s820_s24, 0 }
   0xb   : > { %p1094_p4 = por %p50_p2, %p49_p1  ;;  %s37_s29 = ssub.s32 %s1015_s22, %s1237_s26 }
   0xc   : > { %p175_p6 = scmp.eq.s32.totalorder %s820_s24, 1  ;;  %p40_p7 = scmp.eq.s32.totalorder %s37_s29, 0 }
   0xd   : > { %p1100_p8 = por %p56_p5, %p55_p3  ;;  %p181_p10 = scmp.eq.s32.totalorder %s821_s25, 1 }
   0xe   : > { %p1104_p9 = por %p175_p6, %p49_p1  ;;  %p823_p12 = scmp.ge.s32.totalorder %s1019_s23, 2 }
   0xf   : > { %s1109_s7 = scalar_select %p40_p7, %s1007_s20, %s42_s27  }
  0x10   : > { %p1111_p11 = por %p181_p10, %p55_p3  ;;  %p846_p13 = scmp.lt.s32.totalorder %s1019_s23, 2 }
  0x11   : > { %s207_s9 = sand.u32 1, %s1007_s20   ;;  %s825_s11 = sshll.u32 %s1015_s22, 3 }
  0x12   : > { %s824_s10 = sshll.u32 %s207_s9, 3  ;;  %s216_s14 = scalar_lea.hbm %s1221_s0, %s825_s11 }
  0x13   : > { %s211_s15 = scalar_lea.vmem [#allocation2], %s824_s10  ;;  %s218_s17 = sshll.u32 %s216_s14, 4  ;;  %s219_s17 = int_to_ptr.hbm [resolvable:$true] %s218_s17 }
  0x14   : > { %s220_s16 = sshll.u32 %s211_s15, 4  ;;  %p839_p0 = pnand %p846_p13, %p1094_p4  ;;  %s221_s16 = int_to_ptr.vmem [resolvable:$true] %s220_s16 }
  0x15   : > { %p826_p1 = scmp.ge.s32.totalorder %s1019_s23, 1  ;;  %p238_p2 = scmp.lt.s32.totalorder %s1019_s23, 3 }
  0x16   : > { %s208_s24 = scalar_lea.sflag [#allocation3], %s207_s9 }
  0x17   : > { %841 = dma.hbm_to_vmem [thread:$0]  (!%p839_p0), %s219_s17, 128, %s221_s16, %s208_s24  }
  0x18   : > { %p239_p3 = pnand %p826_p1, %p238_p2 }
  0x19   : > { %s1127_s25 = sand.u32 (!%p239_p3), 1, %s1003_s19  }
  0x1a   : > { %242 = sbr.rel (%p239_p3) target bundleno = 493 (0x1ed), region = 40  ;;  %s827_s27 = sshll.u32 (!%p239_p3), %s1127_s25, 3 }
  0x1b   : > { %s245_s29 = scalar_lea.sflag (!%p239_p3), [#allocation3], %s1127_s25  ;;  %s248_s10 = scalar_lea.vmem (!%p239_p3), [#allocation2], %s827_s27 }
  0x1f   : > { %990 = dma.done.wait (%p1100_p8), %s245_s29, 128  }
  0x20   : > { %992 = vsyncadd (%p1100_p8), %s245_s29, 4294967168  ;;  %v294_v0 = vld [vmem:[%s1225_s4 + $0x18] sm:$0xff]  ;;  %v293_v1 = vld [vmem:[%s1225_s4 + $0x10] sm:$0xff]  ;;  %vm299_vm0 = vcmask 261120   ;;  %v1021_v35 = vmov 1   ;;  %v1022_v36 = vmov 0  }
  0x21   : > { %v292_v2 = vld [vmem:[%s1225_s4 + $0x8] sm:$0xff]  ;;  %v298_v3 = vmul.f32 0.17677669, %v294_v0  ;;  %v297_v4 = vmul.f32 0.17677669, %v293_v1  ;;  %v291_v6 = vld [vmem:[%s1225_s4] sm:$0xff]  ;;  %899 = vset.pattern.permute.xlu1 %v1021_v35  ;;  %898 = vset.pattern.permute.xlu0 %v1022_v36 }
  0x22   : > { %v296_v5 = vmul.f32 0.17677669, %v292_v2  ;;  %v290_v7 = vld [vmem:[%s248_s10] sm:$0xff]  ;;  %v295_v11 = vmul.f32 0.17677669, %v291_v6  ;;  %p283_p4 = scmp.lt.s32.totalorder %s1011_s21, 1 }
  0x23   : > { %v315_v8 = vand.u32 4294901760, %v298_v3  ;;  %v317_v9 = vand.u32 4294901760, %v297_v4  ;;  %v301_v12 = vsel %vm299_vm0, %v290_v7, 0  ;;  %v522_v49 = vld [vmem:[%s1224_s3 + $0x10] sm:$0xff]  ;;  %v521_v51 = vld [vmem:[%s1224_s3 + $0x8] sm:$0xff]  ;;  %v520_v54 = vld [vmem:[%s1224_s3] sm:$0xff] }
  0x24   : > { %v319_v10 = vand.u32 4294901760, %v296_v5  ;;  %v321_v16 = vand.u32 4294901760, %v295_v11  ;;  %v323_v17 = vand.u32 4294901760, %v301_v12  ;;  %s1151_s30 = scalar_select %p283_p4, %s1011_s21, 1  ;;  %v540_v50 = vand.u32 4294901760, %v522_v49 }
  0x25   : > { %v345_v13 = vsub.f32 %v298_v3, %v315_v8  ;;  %316 = vmatpush.msra.mxu0 %v315_v8  ;;  %v351_v14 = vsub.f32 %v297_v4, %v317_v9  ;;  %416 = vmatpush.msra.mxu3 %v315_v8  ;;  %v542_v53 = vand.u32 4294901760, %v521_v51  ;;  %v544_v57 = vand.u32 4294901760, %v520_v54  ;;  %s703_s14 = scalar_lea.sflag [#allocation4], %s1127_s25 }
  0x26   : > { %v357_v15 = vsub.f32 %v296_v5, %v319_v10  ;;  %v363_v20 = vsub.f32 %v295_v11, %v321_v16  ;;  %v324_v22 = vsub.f32 %v301_v12, %v323_v17  ;;  %s829_s17 = sshll.u32 %s1151_s30, 1  ;;  %s285_s10 = scalar_lea.vmem %s1222_s1, %s1151_s30  ;;  %v569_v52 = vsub.f32 %v522_v49, %v540_v50 }
  0x27   : > { %387 = vmatpush.msra.mxu2 %v345_v13  ;;  %318 = vmatpush.msra.mxu0 %v317_v9  ;;  %v346_v18 = vand.u32 4294901760, %v345_v13  ;;  %v352_v19 = vand.u32 4294901760, %v351_v14  ;;  %s1161_s11 = scalar_lea.vmem %s1223_s2, %s829_s17  ;;  %v575_v56 = vsub.f32 %v521_v51, %v542_v53  ;;  %v581_v60 = vsub.f32 %v520_v54, %v544_v57  ;;  %v900_v4 = vld [vmem:[%s285_s10] ss:$0 sm:$0xff]  ;;  %s831_s30 = sshll.u32 %s1011_s21, 3 }
  0x28   : > { %v358_v21 = vand.u32 4294901760, %v357_v15  ;;  %418 = vmatpush.msra.mxu3 %v317_v9  ;;  %v364_v26 = vand.u32 4294901760, %v363_v20  ;;  %v325_v27 = vand.u32 4294901760, %v324_v22  ;;  %v570_v55 = vand.u32 4294901760, %v569_v52  ;;  %v901_v5 = vld [vmem:[%s1161_s11] ss:$0 sm:$0xff]  ;;  %s714_s9 = scalar_lea.hbm %s1226_s5, %s831_s30 }
  0x29   : > { %390 = vmatpush.msra.mxu2 %v351_v14  ;;  %v347_v23 = vsub.f32 %v345_v13, %v346_v18  ;;  %320 = vmatpush.msra.mxu0 %v319_v10  ;;  %v353_v24 = vsub.f32 %v351_v14, %v352_v19  ;;  %v576_v59 = vand.u32 4294901760, %v575_v56  ;;  %v582_v63 = vand.u32 4294901760, %v581_v60  ;;  %v902_v6 = vld [vmem:[%s1161_s11 + $0x1] ss:$0 sm:$0xff]  ;;  %s282_s11 = scalar_lea.vmem [#allocation5], %s827_s27  ;;  %s718_s13 = sshll.u32 %s714_s9, 4  ;;  %s719_s13 = int_to_ptr.hbm [resolvable:$true] %s718_s13 }
  0x2a   : > { %v359_v25 = vsub.f32 %v357_v15, %v358_v21  ;;  %420 = vmatpush.msra.mxu3 %v319_v10  ;;  %v365_v30 = vsub.f32 %v363_v20, %v364_v26  ;;  %v326_v31 = vsub.f32 %v324_v22, %v325_v27  ;;  %v571_v58 = vsub.f32 %v569_v52, %v570_v55  ;;  %s716_s12 = sshll.u32 %s282_s11, 4  ;;  %s951_s15 = sshra.s32 %s719_s13, 4  ;;  %s717_s12 = int_to_ptr.vmem [resolvable:$true] %s716_s12  ;;  %s952_s15 = int_to_ptr.hbm [resolvable:$true] %s951_s15 }
  0x2b   : > { %v348_v28 = vand.u32 4294901760, %v347_v23  ;;  %393 = vmatpush.msra.mxu2 %v357_v15  ;;  %v354_v29 = vand.u32 4294901760, %v353_v24  ;;  %322 = vmatpush.msra.mxu0 %v321_v16  ;;  %v577_v62 = vsub.f32 %v575_v56, %v576_v59  ;;  %v583_v1 = vsub.f32 %v581_v60, %v582_v63  ;;  %s953_s21 = scalar_lea.hbm %s952_s15, 8  ;;  %s957_s27 = scalar_lea.hbm %s1226_s5, 16 }
  0x2c   : > { %422 = vmatpush.msra.mxu3 %v321_v16  ;;  %v360_v32 = vand.u32 4294901760, %v359_v25  ;;  %v327_v33 = vand.u32 4294901760, %v326_v31  ;;  %v366_v34 = vand.u32 4294901760, %v365_v30  ;;  %v572_v61 = vand.u32 4294901760, %v571_v58  ;;  %p954_p5 = scmp.ne.s32.totalorder %s952_s15, %s953_s21  ;;  %p958_p8 = scmp.lt.s32.totalorder %s952_s15, %s1226_s5 }
  0x2d   : > { %445 = vmatpush.msrb.mxu0 %v346_v18  ;;  %349 = vmatpush.msra.mxu1 %v348_v28  ;;  %v578_v0 = vand.u32 4294901760, %v577_v62  ;;  %v584_v2 = vand.u32 4294901760, %v583_v1  ;;  %vm523_vm3 = vcmask 195584   ;;  %p959_p10 = scmp.lt.s32.totalorder %s957_s27, %s953_s21 }
  0x2e   : > { %396 = vmatpush.msra.mxu2 %v363_v20  ;;  %426 = vmatmul.f32.vlgmr.msra.gmra.mxu3 %v325_v27  ;;  %p955_p6 = pnand %p954_p5, %p1104_p9 }
  0x2f   : > { %399 = vmatmul.f32.vlgmr.msra.gmra.mxu2 %v324_v22  ;;  %355 = vmatpush.msra.mxu1 %v354_v29  ;;  %p960_p13 = por %p959_p10, %p958_p8 }
  0x30   : > { %449 = vmatpush.msrb.mxu0 %v352_v19  ;;  %541 = vmatpush.msrb.mxu2 %v540_v50  ;;  %p956_p7 = pneg %p955_p6 }
  0x31   : > { %328 = vmatmul.f32.vlgmr.msra.gmra.mxu0 %v327_v33  ;;  %361 = vmatpush.msra.mxu1 %v360_v32 }
  0x32   : > { %453 = vmatpush.msrb.mxu0 %v358_v21  ;;  %543 = vmatpush.msrb.mxu2 %v542_v53  ;;  %p961_p0 = pnand %p960_p13, %p956_p7 }
  0x33   : > { %367 = vmatpush.msra.mxu1 %v366_v34  ;;  %573 = vmatpush.msrb.mxu3 %v572_v61 }
  0x34   : > { %457 = vmatpush.msrb.mxu0 %v364_v26  ;;  %369 = vmatmul.f32.vlgmr.msra.gmra.mxu1 %v323_v17 }
  0x35   : > { %476 = vmatpush.msrb.mxu1 %v315_v8  ;;  %545 = vmatpush.msrb.mxu2 %v544_v57 }
  0x36   : > { %606 = vmatpush.msra.mxu0 %v569_v52  ;;  %579 = vmatpush.msrb.mxu3 %v578_v0 }
  0x37   : > { %478 = vmatpush.msrb.mxu1 %v317_v9  ;;  %661 = vmatpush.msra.mxu2 %v570_v55 }
  0x38   : > { %609 = vmatpush.msra.mxu0 %v575_v56  ;;  %585 = vmatpush.msrb.mxu3 %v584_v2 }
  0x39   : > { %459 = vmatmul.f32.vlgmr.msrb.gmra.mxu0 %v323_v17  ;;  %480 = vmatpush.msrb.mxu1 %v319_v10 }
  0x3a   : > { %612 = vmatpush.msra.mxu0 %v581_v60  ;;  %665 = vmatpush.msra.mxu2 %v576_v59 }
  0x3b   : > { %482 = vmatpush.msrb.mxu1 %v321_v16  ;;  %689 = vmatpush.msra.mxu3 %v540_v50 }
  0x3c   : > { %484 = vmatmul.f32.vlgmr.msrb.gmra.mxu1 %v323_v17  ;;  %669 = vmatpush.msra.mxu2 %v582_v63 }
  0x3d   : > { %633 = vmatpush.msra.mxu1 %v540_v50  ;;  %691 = vmatpush.msra.mxu3 %v542_v53 }
  0x3f   : > { %635 = vmatpush.msra.mxu1 %v542_v53  ;;  %693 = vmatpush.msra.mxu3 %v544_v57 }
  0x41   : > { %637 = vmatpush.msra.mxu1 %v544_v57 }
  0xae   : > { %v329_v37 = vpop.f32.mrf.mxu0 }
  0xb1   : > { %v370_v38 = vpop.f32.mrf.mxu1  ;;  %v427_v41 = vpop.f32.mrf.mxu3 }
  0xb2   : > { %v400_v39 = vpop.f32.mrf.mxu2  ;;  %v371_v40 = vadd.f32 %v370_v38, %v329_v37 }
  0xb4   : > { %v401_v42 = vadd.f32 %v400_v39, %v371_v40 }
  0xb6   : > { %v460_v43 = vpop.f32.mrf.mxu0  ;;  %v428_v44 = vadd.f32 %v427_v41, %v401_v42 }
  0xb8   : > { %v461_v45 = vadd.f32 %v460_v43, %v428_v44 }
  0xb9   : > { %v485_v46 = vpop.f32.mrf.mxu1 }
  0xba   : > { %v486_v47 = vadd.f32 %v485_v46, %v461_v45 }
  0xbc   : > { %501 = vperm.xlu1 %899, %v486_v47   ;;  %493 = vperm.xlu0 %898, %v486_v47   ;;  %vm505_vm1 = vcmp.ge.f32.partialorder %v486_v47, 0.0 }
  0xbd   : > { %v510_v48 = vsel %vm505_vm1, 1, %v1022_v36 }
  0xc4   : > { %512 = vperm.xlu0 %898, %v510_v48  }
 0x12e   : > { %v494_v3 = vpop.permute.xlu0 %493  ;;  %v502_v11 = vpop.permute.xlu1 %501 }
 0x12f   : > { %v499_v7 = vmul.f32 %v900_v4, %v494_v3  ;;  %v507_v8 = vmul.f32 %v901_v5, %v494_v3  ;;  %v509_v9 = vmul.f32 %v902_v6, %v494_v3 }
 0x131   : > { %v504_v13 = vadd.f32 %v502_v11, %v499_v7 }
 0x136   : > { %v513_v10 = vpop.permute.xlu0 %512 }
 0x137   : > { %vm514_vm2 = vcmp.eq.s32.totalorder %v513_v10, 1 }
 0x138   : > { %v515_v12 = vsel %vm514_vm2, %v507_v8, %v509_v9 }
 0x139   : > { %v516_v14 = vadd.f32 %v515_v12, %v502_v11 }
 0x13b   : > { %v517_v15 = vsub.f32 %v504_v13, %v516_v14 }
 0x13d   : > { %v518_v16 = vmul.f32 1.442695, %v517_v15 }
 0x13f   : > { %903 = vpow2.f32 %v518_v16 }
 0x145   : > { %v904_v17 = vpop.eup %903 }
 0x146   : > { %v525_v18 = vsel %vm523_vm3, %v904_v17, 0 }
 0x147   : > { %v546_v19 = vand.u32 4294901760, %v525_v18 }
 0x149   : > { %587 = vmatmul.f32.vlgmr.msrb.gmra.mxu3 %v546_v19  ;;  %v547_v20 = vsub.f32 %v525_v18, %v546_v19 }
 0x14b   : > { %615 = vmatmul.f32.vlgmr.msra.gmra.mxu0 %v547_v20  ;;  %v548_v21 = vand.u32 4294901760, %v547_v20 }
 0x14d   : > { %641 = vmatmul.f32.vlgmr.msra.gmra.mxu1 %v548_v21  ;;  %v549_v22 = vsub.f32 %v547_v20, %v548_v21 }
 0x14f   : > { %v550_v23 = vand.u32 4294901760, %v549_v22 }
 0x151   : > { %551 = vmatmul.f32.vlgmr.msrb.gmra.mxu2 %v550_v23  ;;  %695 = vmatmul.f32.vlgmr.msra.gmra.mxu3 %v546_v19 }
 0x159   : > { %671 = vmatmul.f32.vlgmr.msra.gmra.mxu2 %v546_v19 }
 0x1c8   : > { %v616_v27 = vpop.f32.mrf.mxu0 }
 0x1ca   : > { %v642_v29 = vpop.f32.mrf.mxu1 }
 0x1cc   : > { %v588_v24 = vpop.f32.mrf.mxu3 }
 0x1d4   : > { %v552_v25 = vpop.f32.mrf.mxu2  ;;  %v696_v33 = vpop.f32.mrf.mxu3 }
 0x1d5   : > { %v589_v26 = vadd.f32 %v588_v24, %v552_v25 }
 0x1d7   : > { %v617_v28 = vadd.f32 %v616_v27, %v589_v26 }
 0x1d9   : > { %v643_v30 = vadd.f32 %v642_v29, %v617_v28 }
 0x1dc   : > { %v672_v31 = vpop.f32.mrf.mxu2 }
 0x1dd   : > { %v673_v32 = vadd.f32 %v672_v31, %v643_v30 }
 0x1df   : > { %v697_v34 = vadd.f32 %v696_v33, %v673_v32 }
 0x1e1   : > { %905 = vrcp.f32 %v697_v34 }
 0x1e7   : > { %v906_v35 = vpop.eup %905 }
 0x1e8   : > { %v700_v36 = vmul.f32 %v906_v35, %v904_v17 }
 0x1ea   : > { %701 = vst.msk [vmem:[%s282_s11] sm:$0xff] %vm523_vm3, %v700_v36 }
 0x1eb   : > { %964 = shalt.err (!%p961_p0)
}
 0x1ec   : > { %836 = dma.vmem_to_hbm [thread:$0]  (%p1104_p9), %s717_s12, 128, %s719_s13, %s703_s14  }
 0x1ed PF: > { %s730_s25 = sand.u32 1, %s999_s18   ;;  %p843_p1 = pnand %p823_p12, %p1111_p11 }
 0x1ee   : > { %s731_s30 = scalar_lea.sflag [#allocation4], %s730_s25 }
 0x1ef   : > { %p844_p2 = pneg %p843_p1 }
 0x1f1   : > { %994 = dma.done.wait (%p844_p2), %s731_s30, 128  }
 0x1f2   : > { %996 = vsyncadd (%p844_p2), %s731_s30, 4294967168  ;;  %s21_s23 = sadd.s32 1, %s1019_s23   ;;  %s1231_s18 = smov %s1003_s19 }
 0x1f3   : > { %p18_p3 = scmp.ge.s32.totalorder %s21_s23, 4   ;;  %s1232_s19 = smov %s1007_s20 }
 0x1f4   : > { %s1233_s20 = smov %s1109_s7  ;;  %s1234_s21 = smov %s1015_s22 }
 0x1f5   : > { %s1235_s22 = smov %s1237_s26  ;;  %20 = sbr.rel (!%p18_p3) target bundleno = 6 (0x6), region = 91 }
 0x1fa   :  { %737 = vsyncpa [#allocation3], 1 }
 0x1fb   :  { %739 = vsyncpa [#allocation3 + $0x1], 1 }
 0x1fc   :  { %740 = vsyncpa [#allocation4], 1 }
 0x1fd   :  { %742 = vsyncpa [#allocation4 + $0x1], 1 }

</bundles_post_ra>
